<compile_context>
chip_gen: v6e
topology: v6e:2x2x1
jax: 0.10.0
libtpu: 0.0.40
codegen_flags: <defaults>
</compile_context>

<pallas_src>
import functools

import jax
import jax.numpy as jnp
from jax.experimental import pallas as pl
from jax.experimental.pallas import tpu as pltpu


def _episym_kernel(pts_ref, f_ref, out_ref, *, margin, block_b, n_valid, n_pad, b_valid, b_pad):
    """pts_ref: (4, block_b, n_pad) VMEM — [x1, y1, x2, y2] coordinate planes.
       f_ref:   (block_b, 9) VMEM — row-major fundamental matrices.
       out_ref: (1, 1) SMEM — partial sum for this batch block."""
    x1 = pts_ref[0]  # (block_b, n_pad)
    y1 = pts_ref[1]
    x2 = pts_ref[2]
    y2 = pts_ref[3]

    # F coefficients as (block_b, 1) columns, broadcast across the lane (point) axis.
    f = [f_ref[:, k:k + 1] for k in range(9)]

    # line1_in_2 = [x1 y1 1] @ F^T ; line2_in_1 = [x2 y2 1] @ F (only first two comps needed).
    l1_0 = f[0] * x1 + f[1] * y1 + f[2]
    l1_1 = f[3] * x1 + f[4] * y1 + f[5]
    l1_2 = f[6] * x1 + f[7] * y1 + f[8]
    l2_0 = f[0] * x2 + f[3] * y2 + f[6]
    l2_1 = f[1] * x2 + f[4] * y2 + f[7]

    num = x2 * l1_0 + y2 * l1_1 + l1_2
    num = num * num
    a = l1_0 * l1_0 + l1_1 * l1_1
    b = l2_0 * l2_0 + l2_1 * l2_1
    # kornia SED (squared=True, no eps): num * (1/a + 1/b) == num * (a + b) * recip(a * b).
    geod = num * (a + b) * pl.reciprocal(a * b, approx=False)

    # torch.min(geod, margin * ones_like(geod))
    clamped = jnp.minimum(geod, jnp.float32(margin))

    # Zero out lane / row padding before the block reduce (emitted only if padding exists).
    valid = None
    if n_valid < n_pad:
        lane = jax.lax.broadcasted_iota(jnp.int32, clamped.shape, 1)
        valid = lane < n_valid
    if b_valid < b_pad:
        row = jax.lax.broadcasted_iota(jnp.int32, clamped.shape, 0) + pl.program_id(0) * block_b
        rmask = row < b_valid
        valid = rmask if valid is None else (valid & rmask)
    if valid is not None:
        clamped = jnp.where(valid, clamped, jnp.float32(0.0))

    # Single cross-lane reduce per (large) block; final scale happens in the wrapper.
    out_ref[0, 0] = jnp.sum(clamped)


def _round_up(x, m):
    return ((x + m - 1) // m) * m


def _choose_block_b(batch, n_pad, target_bytes=2 << 20):
    """How many batch rows to fuse per grid step (~2 MiB pts tiles, sublane-aligned).

    With double-buffering this keeps the pipeline footprint ~4-5 MiB, safe under the
    default scoped-VMEM limit on v5e/v6e/v7x while amortizing per-grid-step overhead."""
    per_row_bytes = 4 * n_pad * 4  # 4 coordinate planes, f32
    if batch <= 8:
        return int(batch)
    bb = max(1, target_bytes // per_row_bytes)
    bb = min(bb, batch)
    bb = max(8, (bb // 8) * 8)  # keep a multiple of 8 sublanes
    return int(bb)


def episym_loss_planes(pts_planes, fm, geo_loss_margin, *, block_b=None):
    """Core entry. pts_planes: (4, B, N) f32 planes [x1, y1, x2, y2]; fm: (B, 9) f32."""
    _, B, N = pts_planes.shape
    n_pad = _round_up(max(N, 128), 128)
    if block_b is None:
        block_b = _choose_block_b(B, n_pad)
    b_pad = _round_up(B, block_b)
    grid = b_pad // block_b

    if (b_pad != B) or (n_pad != N):
        pts_planes = jnp.pad(pts_planes, ((0, 0), (0, b_pad - B), (0, n_pad - N)))
        # Pad F rows with ones so padded rows stay finite (they are masked out anyway).
        fm = jnp.pad(fm, ((0, b_pad - B), (0, 0)), constant_values=1.0)

    kernel = functools.partial(
        _episym_kernel,
        margin=float(geo_loss_margin),
        block_b=block_b,
        n_valid=N, n_pad=n_pad,
        b_valid=B, b_pad=b_pad,
    )

    # Advisory cost hint for the XLA scheduler (mem-light, VPU-elementwise + one div per point).
    n_elems = b_pad * n_pad
    cost = pl.CostEstimate(
        flops=36 * n_elems,
        transcendentals=n_elems,
        bytes_accessed=4 * n_elems * 4 + b_pad * 9 * 4 + grid * 4,
    )

    partials = pl.pallas_call(
        kernel,
        grid=(grid,),
        in_specs=[
            pl.BlockSpec((4, block_b, n_pad), lambda g: (0, g, 0)),
            pl.BlockSpec((block_b, 9), lambda g: (g, 0)),
        ],
        out_specs=pl.BlockSpec((1, 1), lambda g: (g, 0), memory_space=pltpu.SMEM),
        out_shape=jax.ShapeDtypeStruct((grid, 1), jnp.float32),
        compiler_params=pltpu.CompilerParams(dimension_semantics=("parallel",)),
        cost_estimate=cost,
    )(pts_planes, fm)

    # mean over points then mean over batch == sum / (B * N) (every row has the same N).
    return jnp.sum(partials) * (1.0 / float(B * N))


def episym_loss(pts_virt, pred_shape, geo_loss_margin, *, block_b=None):
    """Module-interface wrapper. pts_virt: (B, N, 4) = [x1, y1, x2, y2]; pred_shape: (B, 9) or (B, 3, 3).
    NOTE: ideally the producer emits the (4, B, N) plane layout directly so this one-time layout
    conversion (an extra HBM read+write on tiny loss-sized data) disappears; the kernel itself
    never transposes."""
    B, N, _ = pts_virt.shape
    pts_planes = jnp.transpose(pts_virt.astype(jnp.float32), (2, 0, 1))  # (4, B, N)
    fm = pred_shape.reshape(B, 9).astype(jnp.float32)
    return episym_loss_planes(pts_planes, fm, geo_loss_margin, block_b=block_b)


def _episym_loss_ref(pts_virt, pred_shape, geo_loss_margin):
    """Pure-JAX reference of kornia SED + clamp + mean (sanity check)."""
    B, N, _ = pts_virt.shape
    pts1 = pts_virt[:, :, :2].astype(jnp.float32)
    pts2 = pts_virt[:, :, 2:].astype(jnp.float32)
    ones = jnp.ones((B, N, 1), jnp.float32)
    p1 = jnp.concatenate([pts1, ones], axis=-1)
    p2 = jnp.concatenate([pts2, ones], axis=-1)
    Fm = pred_shape.reshape(B, 3, 3).astype(jnp.float32)
    hp = jax.lax.Precision.HIGHEST
    line1_in_2 = jnp.einsum("bnk,bjk->bnj", p1, Fm, precision=hp)  # p1 @ F^T
    line2_in_1 = jnp.einsum("bnk,bkj->bnj", p2, Fm, precision=hp)  # p2 @ F
    num = jnp.sum(p2 * line1_in_2, axis=-1) ** 2
    den_inv = 1.0 / jnp.sum(line1_in_2[..., :2] ** 2, axis=-1) + 1.0 / jnp.sum(
        line2_in_1[..., :2] ** 2, axis=-1
    )
    geod = num * den_inv
    clamped = jnp.minimum(geod, geo_loss_margin)
    return clamped.mean(axis=1).mean()


if __name__ == "__main__":
    # args.loss_type == 'SED', args.geo_loss_margin
    GEO_LOSS_MARGIN = 0.1
    key = jax.random.PRNGKey(0)
    k_pts, k_f, k_pts2, k_f2 = jax.random.split(key, 4)

    # Primary config: batch of 2, 128 virtual correspondences (no padding, single block).
    B, N = 2, 128
    pts_virt = jax.random.normal(k_pts, (B, N, 4), dtype=jnp.float32)       # supp_data['pts_virt']
    pred_shape = jax.random.normal(k_f, (B, 9), dtype=jnp.float32)          # supp_pred['pred_shape']

    loss = episym_loss(pts_virt, pred_shape, GEO_LOSS_MARGIN)
    jax.block_until_ready(loss)
    ref = _episym_loss_ref(pts_virt, pred_shape, GEO_LOSS_MARGIN)
    assert jnp.allclose(loss, ref, rtol=1e-4, atol=1e-6), (loss, ref)

    # Secondary config: exercises lane/row padding masks and the multi-block "parallel" grid.
    B2, N2 = 11, 200
    pts_virt2 = jax.random.normal(k_pts2, (B2, N2, 4), dtype=jnp.float32)
    pred_shape2 = jax.random.normal(k_f2, (B2, 3, 3), dtype=jnp.float32)
    loss2 = episym_loss(pts_virt2, pred_shape2, GEO_LOSS_MARGIN, block_b=8)
    jax.block_until_ready(loss2)
    ref2 = _episym_loss_ref(pts_virt2, pred_shape2, GEO_LOSS_MARGIN)
    assert jnp.allclose(loss2, ref2, rtol=1e-4, atol=1e-6), (loss2, ref2)

    print("KERNEL_OK")
</pallas_src>

<mosaic_0001>
module attributes {stable_mosaic.version = 11 : i64} {
  func.func @_episym_kernel(%arg0: i32, %arg1: memref<4x2x128xf32, #tpu.memory_space<vmem>>, %arg2: memref<2x9xf32, #tpu.memory_space<vmem>>, %arg3: memref<1x1xf32, #tpu.memory_space<smem>>) attributes {dimension_semantics = [#tpu.dimension_semantics<parallel>], iteration_bounds = array<i64: 1>, scalar_prefetch = 0 : i64, scratch_operands = 0 : i64, tpu.core_type = #tpu.core_type<tc>, window_params = [{transform_indices = @transform_0, window_bounds = array<i64: 4, 2, 128>}, {transform_indices = @transform_1, window_bounds = array<i64: 2, 9>}, {transform_indices = @transform_2, window_bounds = array<i64: 1, 1>}]} {
    %c0 = arith.constant 0 : index
    %c0_0 = arith.constant 0 : index
    %c0_1 = arith.constant 0 : index
    %0 = vector.load %arg1[%c0, %c0_0, %c0_1] : memref<4x2x128xf32, #tpu.memory_space<vmem>>, vector<1x2x128xf32>
    %1 = vector.shape_cast %0 : vector<1x2x128xf32> to vector<2x128xf32>
    %c1 = arith.constant 1 : index
    %c0_2 = arith.constant 0 : index
    %c0_3 = arith.constant 0 : index
    %2 = vector.load %arg1[%c1, %c0_2, %c0_3] : memref<4x2x128xf32, #tpu.memory_space<vmem>>, vector<1x2x128xf32>
    %3 = vector.shape_cast %2 : vector<1x2x128xf32> to vector<2x128xf32>
    %c2 = arith.constant 2 : index
    %c0_4 = arith.constant 0 : index
    %c0_5 = arith.constant 0 : index
    %4 = vector.load %arg1[%c2, %c0_4, %c0_5] : memref<4x2x128xf32, #tpu.memory_space<vmem>>, vector<1x2x128xf32>
    %5 = vector.shape_cast %4 : vector<1x2x128xf32> to vector<2x128xf32>
    %c3 = arith.constant 3 : index
    %c0_6 = arith.constant 0 : index
    %c0_7 = arith.constant 0 : index
    %6 = vector.load %arg1[%c3, %c0_6, %c0_7] : memref<4x2x128xf32, #tpu.memory_space<vmem>>, vector<1x2x128xf32>
    %7 = vector.shape_cast %6 : vector<1x2x128xf32> to vector<2x128xf32>
    %c0_8 = arith.constant 0 : index
    %c0_9 = arith.constant 0 : index
    %8 = vector.load %arg2[%c0_8, %c0_9] : memref<2x9xf32, #tpu.memory_space<vmem>>, vector<2x1xf32>
    %c0_10 = arith.constant 0 : index
    %c1_11 = arith.constant 1 : index
    %9 = vector.load %arg2[%c0_10, %c1_11] : memref<2x9xf32, #tpu.memory_space<vmem>>, vector<2x1xf32>
    %c0_12 = arith.constant 0 : index
    %c2_13 = arith.constant 2 : index
    %10 = vector.load %arg2[%c0_12, %c2_13] : memref<2x9xf32, #tpu.memory_space<vmem>>, vector<2x1xf32>
    %c0_14 = arith.constant 0 : index
    %c3_15 = arith.constant 3 : index
    %11 = vector.load %arg2[%c0_14, %c3_15] : memref<2x9xf32, #tpu.memory_space<vmem>>, vector<2x1xf32>
    %c0_16 = arith.constant 0 : index
    %c4 = arith.constant 4 : index
    %12 = vector.load %arg2[%c0_16, %c4] : memref<2x9xf32, #tpu.memory_space<vmem>>, vector<2x1xf32>
    %c0_17 = arith.constant 0 : index
    %c5 = arith.constant 5 : index
    %13 = vector.load %arg2[%c0_17, %c5] : memref<2x9xf32, #tpu.memory_space<vmem>>, vector<2x1xf32>
    %c0_18 = arith.constant 0 : index
    %c6 = arith.constant 6 : index
    %14 = vector.load %arg2[%c0_18, %c6] : memref<2x9xf32, #tpu.memory_space<vmem>>, vector<2x1xf32>
    %c0_19 = arith.constant 0 : index
    %c7 = arith.constant 7 : index
    %15 = vector.load %arg2[%c0_19, %c7] : memref<2x9xf32, #tpu.memory_space<vmem>>, vector<2x1xf32>
    %c0_20 = arith.constant 0 : index
    %c8 = arith.constant 8 : index
    %16 = vector.load %arg2[%c0_20, %c8] : memref<2x9xf32, #tpu.memory_space<vmem>>, vector<2x1xf32>
    %17 = vector.broadcast %8 : vector<2x1xf32> to vector<2x128xf32>
    %18 = arith.mulf %17, %1 : vector<2x128xf32>
    %19 = vector.broadcast %9 : vector<2x1xf32> to vector<2x128xf32>
    %20 = arith.mulf %19, %3 : vector<2x128xf32>
    %21 = arith.addf %18, %20 : vector<2x128xf32>
    %22 = vector.broadcast %10 : vector<2x1xf32> to vector<2x128xf32>
    %23 = arith.addf %21, %22 : vector<2x128xf32>
    %24 = vector.broadcast %11 : vector<2x1xf32> to vector<2x128xf32>
    %25 = arith.mulf %24, %1 : vector<2x128xf32>
    %26 = vector.broadcast %12 : vector<2x1xf32> to vector<2x128xf32>
    %27 = arith.mulf %26, %3 : vector<2x128xf32>
    %28 = arith.addf %25, %27 : vector<2x128xf32>
    %29 = vector.broadcast %13 : vector<2x1xf32> to vector<2x128xf32>
    %30 = arith.addf %28, %29 : vector<2x128xf32>
    %31 = vector.broadcast %14 : vector<2x1xf32> to vector<2x128xf32>
    %32 = arith.mulf %31, %1 : vector<2x128xf32>
    %33 = vector.broadcast %15 : vector<2x1xf32> to vector<2x128xf32>
    %34 = arith.mulf %33, %3 : vector<2x128xf32>
    %35 = arith.addf %32, %34 : vector<2x128xf32>
    %36 = vector.broadcast %16 : vector<2x1xf32> to vector<2x128xf32>
    %37 = arith.addf %35, %36 : vector<2x128xf32>
    %38 = vector.broadcast %8 : vector<2x1xf32> to vector<2x128xf32>
    %39 = arith.mulf %38, %5 : vector<2x128xf32>
    %40 = vector.broadcast %11 : vector<2x1xf32> to vector<2x128xf32>
    %41 = arith.mulf %40, %7 : vector<2x128xf32>
    %42 = arith.addf %39, %41 : vector<2x128xf32>
    %43 = vector.broadcast %14 : vector<2x1xf32> to vector<2x128xf32>
    %44 = arith.addf %42, %43 : vector<2x128xf32>
    %45 = vector.broadcast %9 : vector<2x1xf32> to vector<2x128xf32>
    %46 = arith.mulf %45, %5 : vector<2x128xf32>
    %47 = vector.broadcast %12 : vector<2x1xf32> to vector<2x128xf32>
    %48 = arith.mulf %47, %7 : vector<2x128xf32>
    %49 = arith.addf %46, %48 : vector<2x128xf32>
    %50 = vector.broadcast %15 : vector<2x1xf32> to vector<2x128xf32>
    %51 = arith.addf %49, %50 : vector<2x128xf32>
    %52 = arith.mulf %5, %23 : vector<2x128xf32>
    %53 = arith.mulf %7, %30 : vector<2x128xf32>
    %54 = arith.addf %52, %53 : vector<2x128xf32>
    %55 = arith.addf %54, %37 : vector<2x128xf32>
    %56 = arith.mulf %55, %55 : vector<2x128xf32>
    %57 = arith.mulf %23, %23 : vector<2x128xf32>
    %58 = arith.mulf %30, %30 : vector<2x128xf32>
    %59 = arith.addf %57, %58 : vector<2x128xf32>
    %60 = arith.mulf %44, %44 : vector<2x128xf32>
    %61 = arith.mulf %51, %51 : vector<2x128xf32>
    %62 = arith.addf %60, %61 : vector<2x128xf32>
    %63 = arith.addf %59, %62 : vector<2x128xf32>
    %64 = arith.mulf %56, %63 : vector<2x128xf32>
    %65 = arith.mulf %59, %62 : vector<2x128xf32>
    %66 = tpu.reciprocal %65 : vector<2x128xf32> -> vector<2x128xf32>
    %67 = arith.mulf %64, %66 : vector<2x128xf32>
    %cst = arith.constant 1.000000e-01 : f32
    %68 = vector.broadcast %cst : f32 to vector<2x128xf32>
    %69 = arith.minimumf %67, %68 : vector<2x128xf32>
    %70 = vector.shape_cast %69 : vector<2x128xf32> to vector<1x2x128xf32>
    %cst_21 = arith.constant dense<0.000000e+00> : vector<1xf32>
    %71 = vector.multi_reduction <add>, %70, %cst_21 [1, 2] : vector<1x2x128xf32> to vector<1xf32>
    %72 = vector.shape_cast %71 : vector<1xf32> to vector<1x1x1xf32>
    %73 = vector.extract %72[0, 0, 0] : f32 from vector<1x1x1xf32>
    %c0_22 = arith.constant 0 : index
    %c0_23 = arith.constant 0 : index
    %74 = memref.load %arg3[%c0_22, %c0_23] : memref<1x1xf32, #tpu.memory_space<smem>>
    memref.store %73, %arg3[%c0_22, %c0_23] : memref<1x1xf32, #tpu.memory_space<smem>>
    return
  }
  func.func @transform_0(%arg0: i32) -> (i32, i32, i32) {
    %c0_i32 = arith.constant 0 : i32
    %c0_i32_0 = arith.constant 0 : i32
    %c0_i32_1 = arith.constant 0 : i32
    return %c0_i32, %arg0, %c0_i32_0 : i32, i32, i32
  }
  func.func @transform_1(%arg0: i32) -> (i32, i32) {
    %c0_i32 = arith.constant 0 : i32
    %c0_i32_0 = arith.constant 0 : i32
    return %arg0, %c0_i32 : i32, i32
  }
  func.func @transform_2(%arg0: i32) -> (i32, i32) {
    %c0_i32 = arith.constant 0 : i32
    %c0_i32_0 = arith.constant 0 : i32
    return %arg0, %c0_i32 : i32, i32
  }
}

</mosaic_0001>

<bundles_post_ra>
// kernel: tpu_custom_call.1
= control target key start
LH: loop header
LB: loop body
LE: loop exit
PB: predicated region body
PF: predicated region fallthrough
CT: control target
= control target key end

     0   :  { %7 = vsyncpa [#allocation3], 0  ;;  %s267_s0 = inlined_call_operand.hbm [shape: f32[4,2,128], index: 0, kind: input, shape index: {}]   ;;  %s268_s1 = inlined_call_operand.hbm [shape: f32[2,9], index: 1, kind: input, shape index: {}]   ;;  %s269_s2 = inlined_call_operand.hbm [shape: f32[1,1], index: 2, kind: output, shape index: {}]  }
   0x1   :  { %8 = vsyncpa [#allocation6], 0 }
   0x2   :  { %9 = vsyncpa [#allocation4], 0  ;;  %s229_s9 = smov [#allocation2]  }
   0x3   :  { %s15_s10 = sshll.u32 %s229_s9, 4  ;;  %s16_s10 = int_to_ptr.vmem [resolvable:$true] %s15_s10 }
   0x4   :  { %s183_s11 = scalar_lea.vmem %s16_s10, 128  ;;  %p188_p1 = scmp.lt.s32.totalorder %s16_s10, %s16_s10 }
   0x5   :  { %p184_p0 = scmp.ne.s32.totalorder %s16_s10, %s183_s11  ;;  %p189_p2 = scmp.lt.s32.totalorder %s183_s11, %s183_s11 }
   0x7   :  { %p190_p3 = por %p189_p2, %p188_p1 }
   0x9   :  { %p191_p4 = pnand %p190_p3, %p184_p0 }
   0xb   :  { %194 = shalt.err (!%p191_p4)
}
   0xc   :  { %s230_s12 = smov 32   ;;  %s231_s13 = smov 2  }
   0xd   :  { %21 = dma.hbm_to_vmem [thread:$0]  %s267_s0, 128, %s16_s10, [#allocation3], %s230_s12, %s230_s12, %s231_s13  }
   0xe   :  { %s232_s16 = smov [#allocation5]  }
   0xf   :  { %s28_s17 = sshll.u32 %s232_s16, 4  ;;  %s29_s17 = int_to_ptr.vmem [resolvable:$true] %s28_s17 }
  0x10   :  { %s203_s18 = scalar_lea.vmem %s29_s17, 32  ;;  %p208_p6 = scmp.lt.s32.totalorder %s29_s17, %s29_s17 }
  0x11   :  { %p204_p5 = scmp.ne.s32.totalorder %s29_s17, %s203_s18  ;;  %p209_p7 = scmp.lt.s32.totalorder %s203_s18, %s203_s18 }
  0x13   :  { %p210_p8 = por %p209_p7, %p208_p6 }
  0x15   :  { %p211_p9 = pnand %p210_p8, %p204_p5 }
  0x17   :  { %214 = shalt.err (!%p211_p9)
}
  0x18   :  { %31 = dma.hbm_to_vmem [thread:$0]  %s268_s1, 32, %s29_s17, [#allocation6]  }
  0x19   :  { %223 = dma.done.wait [#allocation3], 128  }
  0x1a   :  { %224 = vsyncadd [#allocation3], 4294967168 }
  0x1b   :  { %225 = dma.done.wait [#allocation6], 32  }
  0x1c   :  { %226 = vsyncadd [#allocation6], 4294967264  ;;  %v233_v0 = vmov 3   ;;  %v234_v1 = vmov 0   ;;  %v45_v2 = vld [vmem:[#allocation5] sm:$0x3] }
  0x1d   :  { %166 = vset.pattern.permute.xlu1 %v233_v0  ;;  %164 = vset.pattern.permute.xlu0 %v234_v1  ;;  %v235_v3 = vmov 4   ;;  %v236_v4 = vmov 1   ;;  %v237_v5 = vmov 2   ;;  %v238_v6 = vmov 5   ;;  %v40_v13 = vld [vmem:[#allocation2 + $0x2] sm:$0x3] }
  0x1e   :  { %64 = vperm.xlu1 %166, %v45_v2   ;;  %48 = vperm.xlu0 %164, %v45_v2   ;;  %v239_v7 = vmov 6   ;;  %v240_v8 = vmov 8   ;;  %v241_v9 = vmov 7   ;;  %v38_v15 = vld [vmem:[#allocation2] sm:$0x3]  ;;  %vm120_vm0 = vcmask 1041408  }
  0x1f   :  { %v44_v19 = vld [vmem:[#allocation2 + $0x6] sm:$0x3]  ;;  %v42_v20 = vld [vmem:[#allocation2 + $0x4] sm:$0x3]  ;;  %s242_s1 = smov [#allocation7]  }
  0x22   :  { %167 = vset.pattern.permute.xlu1 %v235_v3  ;;  %165 = vset.pattern.permute.xlu0 %v236_v4 }
  0x23   :  { %69 = vperm.xlu1 %167, %v45_v2   ;;  %53 = vperm.xlu0 %165, %v45_v2  }
  0x27   :  { %168 = vset.pattern.permute.xlu1 %v237_v5  ;;  %169 = vset.pattern.permute.xlu0 %v238_v6 }
  0x28   :  { %59 = vperm.xlu1 %168, %v45_v2   ;;  %75 = vperm.xlu0 %169, %v45_v2  }
  0x2c   :  { %170 = vset.pattern.permute.xlu1 %v239_v7  ;;  %172 = vset.pattern.permute.xlu0 %v240_v8 }
  0x2d   :  { %80 = vperm.xlu1 %170, %v45_v2   ;;  %91 = vperm.xlu0 %172, %v45_v2  }
  0x31   :  { %171 = vset.pattern.permute.xlu1 %v241_v9 }
  0x32   :  { %85 = vperm.xlu1 %171, %v45_v2  }
  0x99   :  { %v65_v10 = vpop.permute.xlu1 %64  ;;  %v49_v11 = vpop.permute.xlu0 %48 }
  0x9a   :  { %v51_v16 = vmul.f32 %v49_v11, %v38_v15  ;;  %v67_v22 = vmul.f32 %v65_v10, %v38_v15  ;;  %v96_v23 = vmul.f32 %v65_v10, %v44_v19  ;;  %v95_v24 = vmul.f32 %v49_v11, %v42_v20 }
  0x9c   :  { %v97_v33 = vadd.f32 %v96_v23, %v95_v24 }
  0x9e   :  { %v70_v12 = vpop.permute.xlu1 %69  ;;  %v54_v14 = vpop.permute.xlu0 %53 }
  0x9f   :  { %v72_v17 = vmul.f32 %v70_v12, %v40_v13  ;;  %v56_v18 = vmul.f32 %v54_v14, %v40_v13  ;;  %v100_v28 = vmul.f32 %v70_v12, %v44_v19  ;;  %v99_v29 = vmul.f32 %v54_v14, %v42_v20 }
  0xa1   :  { %v57_v25 = vadd.f32 %v56_v18, %v51_v16  ;;  %v73_v26 = vadd.f32 %v72_v17, %v67_v22  ;;  %v101_v35 = vadd.f32 %v100_v28, %v99_v29 }
  0xa3   :  { %v60_v21 = vpop.permute.xlu1 %59  ;;  %v76_v27 = vpop.permute.xlu0 %75 }
  0xa4   :  { %v62_v31 = vadd.f32 %v60_v21, %v57_v25  ;;  %v78_v32 = vadd.f32 %v76_v27, %v73_v26 }
  0xa6   :  { %v108_v37 = vmul.f32 %v62_v31, %v62_v31  ;;  %v109_v38 = vmul.f32 %v78_v32, %v78_v32  ;;  %v103_v48 = vmul.f32 %v62_v31, %v42_v20  ;;  %v104_v49 = vmul.f32 %v78_v32, %v44_v19 }
  0xa8   :  { %v81_v30 = vpop.permute.xlu1 %80  ;;  %v110_v44 = vadd.f32 %v109_v38, %v108_v37  ;;  %v92_v47 = vpop.permute.xlu0 %91  ;;  %v105_v52 = vadd.f32 %v104_v49, %v103_v48 }
  0xa9   :  { %v98_v34 = vadd.f32 %v97_v33, %v81_v30  ;;  %v83_v41 = vmul.f32 %v81_v30, %v38_v15 }
  0xab   :  { %v111_v42 = vmul.f32 %v98_v34, %v98_v34 }
  0xad   :  { %v86_v36 = vpop.permute.xlu1 %85 }
  0xae   :  { %v88_v39 = vmul.f32 %v86_v36, %v40_v13  ;;  %v102_v40 = vadd.f32 %v101_v35, %v86_v36 }
  0xb0   :  { %v112_v43 = vmul.f32 %v102_v40, %v102_v40  ;;  %v89_v46 = vadd.f32 %v88_v39, %v83_v41 }
  0xb2   :  { %v113_v45 = vadd.f32 %v112_v43, %v111_v42  ;;  %v94_v51 = vadd.f32 %v92_v47, %v89_v46 }
  0xb4   :  { %v116_v50 = vmul.f32 %v113_v45, %v110_v44  ;;  %v106_v53 = vadd.f32 %v105_v52, %v94_v51  ;;  %v114_v55 = vadd.f32 %v113_v45, %v110_v44 }
  0xb6   :  { %173 = vrcp.f32 %v116_v50  ;;  %v107_v54 = vmul.f32 %v106_v53, %v106_v53 }
  0xb8   :  { %v115_v56 = vmul.f32 %v114_v55, %v107_v54 }
  0xc3   :  { %v174_v57 = vpop.eup %173 }
  0xc4   :  { %v118_v58 = vmul.f32 %v174_v57, %v115_v56 }
  0xc6   :  { %v119_v59 = vmin.f32 %v118_v58, 0.1 }
  0xc8   :  { %v121_v60 = vsel %vm120_vm0, %v119_v59, 0.0 }
  0xc9   :  { %122 = vadd.xlane.f32.xlu1 %v121_v60 }
 0x152   :  { %v123_v61 = vpop.xlane.xlu1 %122 }
 0x153   :  { %v124_v62 = vrot.slane %v123_v61, 4 }
 0x155   :  { %v125_v63 = vadd.f32 %v124_v62, %v123_v61 }
 0x157   :  { %v126_v0 = vrot.slane %v125_v63, 2 }
 0x159   :  { %v127_v1 = vadd.f32 %v126_v0, %v125_v63 }
 0x15b   :  { %v128_v2 = vrot.slane %v127_v1, 1 }
 0x15d   :  { %v129_v3 = vadd.f32 %v128_v2, %v127_v1 }
 0x15f   :  { %148 = vpush %v129_v3 }
 0x190   :  { %s149_s0 = spop %148 }
 0x191   :  { %132 = sst [smem:[#allocation7]] %s149_s0 }
 0x192   :  { %140 = dma.smem_to_hbm %s242_s1, 16, %s269_s2, [#allocation4]  }
 0x193   :  { %227 = dma.done.wait [#allocation4], 16  }
 0x194   :  { %228 = vsyncadd [#allocation4], 4294967280 }
 0x195   :  { %144 = sfence }
 0x196   :  { %145 = vsyncpa [#allocation3], 1 }
 0x197   :  { %146 = vsyncpa [#allocation6], 1 }
 0x198   :  { %147 = vsyncpa [#allocation4], 1 }

</bundles_post_ra>
